<compile_context>
chip_gen: v7x
topology: tpu7x:2x2x1
jax: 0.10.0
libtpu: 0.0.40
codegen_flags: <defaults>
</compile_context>

<pallas_src>
import functools

import numpy as np
import jax
import jax.numpy as jnp
from jax.experimental import pallas as pl
from jax.experimental.pallas import tpu as pltpu


def _round_up(x, m):
    return ((x + m - 1) // m) * m


def _vmem_limit_bytes():
    # Generation-aware VMEM budget: ~3/4 of physical, capped at 100 MiB.
    # v5e/v6e (128 MiB physical) -> ~96 MiB; v7x (64 MiB physical) -> ~48 MiB.
    try:
        cap = int(pltpu.get_tpu_info().vmem_capacity_bytes)
        if cap <= 0:
            raise ValueError("bad vmem capacity")
        return int(max(min(cap * 3 // 4, 100 * 1024 * 1024), 32 * 1024 * 1024))
    except Exception:
        return 32 * 1024 * 1024  # conservative fallback (worked on all generations)


def _inception_kernel(x_ref, w_ref, b_ref, o_ref, col_ref, *,
                      Cin, Kmax, Wp, HWp_pad, K, Kpad):
    # x_ref:   (1, Cin, L)         flat, padded channel-major image (compute dtype)
    # w_ref:   (Cout, Kpad)        folded, branch-averaged taps (compute dtype)
    # b_ref:   (Cout, 1)           branch-averaged bias, f32
    # o_ref:   (1, Cout, HWp_pad)  lane-dense output slab (junk cols stripped in wrapper)
    # col_ref: (Kpad, HWp_pad)     im2col scratch (compute dtype)

    # Keep the K..Kpad contraction pad rows zeroed.  The matching weight rows are
    # zero, but 0 * uninitialized-VMEM could be NaN; re-zero every step so this is
    # also correct when the batch axis is sharded across TensorCores (megacore).
    if Kpad > K:
        col_ref[K:, :] = jnp.zeros((Kpad - K, HWp_pad), col_ref.dtype)

    # im2col assembly: conv tap (kh, kw) is a contiguous lane-offset slice of the
    # flattened padded image at offset kh*Wp + kw (flat-row shift trick).  The
    # lane-shift cost is paid once per block here, not once per MXU call.
    for kh in range(Kmax):
        for kw in range(Kmax):
            t = kh * Kmax + kw
            off = kh * Wp + kw
            col_ref[t * Cin:(t + 1) * Cin, :] = x_ref[0, :, off:off + HWp_pad]

    # One folded MXU contraction over (taps x Cin); f32 accumulation, f32 bias add.
    acc = jnp.dot(w_ref[...], col_ref[...], preferred_element_type=jnp.float32)
    acc = acc + b_ref[...]

    # Single unmasked, lane-dense store of the whole (Cout, HWp_pad) output slab.
    o_ref[0] = acc.astype(o_ref.dtype)


def inception_block_v1(x_nchw, weights, biases, *, compute_dtype=jnp.bfloat16):
    """weights[i]: (Cout, Cin, 2i+1, 2i+1) (PyTorch OIHW); biases[i]: (Cout,).

    Returns the NCHW mean over the num_kernels parallel same-padded convs.
    """
    num_kernels = len(weights)
    Kmax = 2 * (num_kernels - 1) + 1
    pad = (Kmax - 1) // 2
    N, Cin, H, W = x_nchw.shape
    Cout = weights[0].shape[0]
    Hp, Wp = H + 2 * pad, W + 2 * pad

    HWp = H * Wp                              # flat-row conv output length (per channel)
    HWp_pad = _round_up(HWp, 128)             # lane-aligned output / scratch width
    max_off = (Kmax - 1) * Wp + (Kmax - 1)    # largest tap lane offset
    L = _round_up(max_off + HWp_pad, 128)     # flat input length: every tap read in bounds

    # "Same" spatial padding for the largest (averaged) kernel, then flatten H,W.
    # Input stays channel-major (no NHWC transpose); the zero tail to L covers the
    # reads feeding the (discarded) junk columns / 128-alignment padding.
    x_pad = jnp.pad(x_nchw, ((0, 0), (0, 0), (pad, pad), (pad, pad)))
    x_flat = jnp.pad(x_pad.reshape(N, Cin, Hp * Wp),
                     ((0, 0), (0, 0), (0, L - Hp * Wp))).astype(compute_dtype)

    # Mean over branches == one conv with the branch-averaged, zero-padded-to-Kmax taps
    # (exact, done in f32 before the compute-dtype cast).
    w_sum = jnp.zeros((Cout, Cin, Kmax, Kmax), jnp.float32)
    b_sum = jnp.zeros((Cout,), jnp.float32)
    for i, (w, b) in enumerate(zip(weights, biases)):
        k = 2 * i + 1
        off = pad - i
        w_sum = w_sum.at[:, :, off:off + k, off:off + k].add(w.astype(jnp.float32))
        b_sum = b_sum + b.astype(jnp.float32)
    inv = 1.0 / float(num_kernels)

    # Fold all taps into the contraction dim.  Row order (kh, kw, cin) matches the
    # kernel's im2col scratch; zero-pad K up to a 128 multiple for clean MXU passes.
    K = Kmax * Kmax * Cin
    Kpad = _round_up(K, 128)
    w_folded = jnp.transpose(w_sum * inv, (0, 2, 3, 1)).reshape(Cout, K)
    w_folded = jnp.pad(w_folded, ((0, 0), (0, Kpad - K))).astype(compute_dtype)
    b_avg = (b_sum * inv).reshape(Cout, 1)    # stays f32

    kernel = functools.partial(_inception_kernel, Cin=Cin, Kmax=Kmax, Wp=Wp,
                               HWp_pad=HWp_pad, K=K, Kpad=Kpad)

    out_flat = pl.pallas_call(
        kernel,
        out_shape=jax.ShapeDtypeStruct((N, Cout, HWp_pad), x_nchw.dtype),
        grid_spec=pltpu.PrefetchScalarGridSpec(
            num_scalar_prefetch=0,
            grid=(N,),
            in_specs=[
                pl.BlockSpec((1, Cin, L), lambda n: (n, 0, 0)),
                pl.BlockSpec((Cout, Kpad), lambda n: (0, 0)),
                pl.BlockSpec((Cout, 1), lambda n: (0, 0)),
            ],
            out_specs=pl.BlockSpec((1, Cout, HWp_pad), lambda n: (n, 0, 0)),
            scratch_shapes=[pltpu.VMEM((Kpad, HWp_pad), compute_dtype)],
        ),
        compiler_params=pltpu.CompilerParams(
            dimension_semantics=("parallel",),
            vmem_limit_bytes=_vmem_limit_bytes(),
        ),
    )(x_flat, w_folded, b_avg)

    # Strip the 128-alignment tail and the 2*pad junk columns per flat row, reshape
    # back to NCHW -- contiguous minor-dim slice/reshape, no transpose pass.
    return out_flat[:, :, :HWp].reshape(N, Cout, H, Wp)[:, :, :, :W]


if __name__ == "__main__":
    N, Cin, Cout, H, W = 2, 4, 8, 16, 16
    num_kernels = 3

    key = jax.random.PRNGKey(0)
    x_key, b_key, *w_keys = jax.random.split(key, num_kernels + 2)
    x = jax.random.normal(x_key, (N, Cin, H, W), jnp.float32)

    # Deterministic kaiming_normal_(mode='fan_out', nonlinearity='relu') weights.
    # The module inits biases to 0; small nonzero biases are used here so the bias
    # path is actually exercised by the numerical check.
    weights, biases = [], []
    b_keys = jax.random.split(b_key, num_kernels)
    for i in range(num_kernels):
        k = 2 * i + 1
        fan_out = Cout * k * k
        std = (2.0 / fan_out) ** 0.5
        weights.append(std * jax.random.normal(w_keys[i], (Cout, Cin, k, k), jnp.float32))
        biases.append(0.1 * jax.random.normal(b_keys[i], (Cout,), jnp.float32))

    # Pure-JAX reference: same math as the PyTorch forward (per-branch conv + bias, mean).
    refs = []
    for i in range(num_kernels):
        r = jax.lax.conv_general_dilated(
            x, weights[i], window_strides=(1, 1), padding="SAME",
            dimension_numbers=("NCHW", "OIHW", "NCHW"))
        refs.append(r + biases[i][None, :, None, None])
    ref = jnp.mean(jnp.stack(refs, axis=-1), axis=-1)

    # Exact-semantics path: f32 MXU operands.
    out_f32 = jax.block_until_ready(
        inception_block_v1(x, weights, biases, compute_dtype=jnp.float32))
    assert out_f32.shape == (N, Cout, H, W)
    np.testing.assert_allclose(np.asarray(out_f32), np.asarray(ref),
                               rtol=1e-4, atol=1e-4)

    # Fast path (default): bf16 MXU operands, f32 accumulation.
    out_bf16 = jax.block_until_ready(inception_block_v1(x, weights, biases))
    np.testing.assert_allclose(np.asarray(out_bf16), np.asarray(ref),
                               rtol=3e-2, atol=3e-2)

    print("KERNEL_OK")
</pallas_src>

<mosaic_0001>
module attributes {stable_mosaic.version = 11 : i64} {
  func.func @_inception_kernel(%arg0: i32, %arg1: memref<1x4x512xf32, #tpu.memory_space<vmem>>, %arg2: memref<8x128xf32, #tpu.memory_space<vmem>>, %arg3: memref<8x1xf32, #tpu.memory_space<vmem>>, %arg4: memref<1x8x384xf32, #tpu.memory_space<vmem>>, %arg5: memref<128x384xf32, #tpu.memory_space<vmem>>) attributes {dimension_semantics = [#tpu.dimension_semantics<parallel>], iteration_bounds = array<i64: 2>, scalar_prefetch = 0 : i64, scratch_operands = 1 : i64, tpu.core_type = #tpu.core_type<tc>, window_params = [{transform_indices = @transform_0, window_bounds = array<i64: 1, 4, 512>}, {pipeline_mode = #tpu.pipeline_mode<synchronous>, transform_indices = @transform_1, window_bounds = array<i64: 8, 128>}, {pipeline_mode = #tpu.pipeline_mode<synchronous>, transform_indices = @transform_2, window_bounds = array<i64: 8, 1>}, {transform_indices = @transform_3, window_bounds = array<i64: 1, 8, 384>}]} {
    %cst = arith.constant 0.000000e+00 : f32
    %0 = vector.broadcast %cst : f32 to vector<28x384xf32>
    %c100 = arith.constant 100 : index
    %c0 = arith.constant 0 : index
    %1 = vector.load %arg5[%c100, %c0] : memref<128x384xf32, #tpu.memory_space<vmem>>, vector<28x384xf32>
    tpu.vector_store %arg5[%c100, %c0], %0 {strides = array<i32>} : memref<128x384xf32, #tpu.memory_space<vmem>>, vector<28x384xf32>,
    %c0_0 = arith.constant 0 : index
    %c0_1 = arith.constant 0 : index
    %c0_2 = arith.constant 0 : index
    %2 = vector.load %arg1[%c0_0, %c0_1, %c0_2] : memref<1x4x512xf32, #tpu.memory_space<vmem>>, vector<1x4x384xf32>
    %3 = vector.shape_cast %2 : vector<1x4x384xf32> to vector<4x384xf32>
    %c0_3 = arith.constant 0 : index
    %c0_4 = arith.constant 0 : index
    %4 = vector.load %arg5[%c0_3, %c0_4] : memref<128x384xf32, #tpu.memory_space<vmem>>, vector<4x384xf32>
    tpu.vector_store %arg5[%c0_3, %c0_4], %3 {strides = array<i32>} : memref<128x384xf32, #tpu.memory_space<vmem>>, vector<4x384xf32>,
    %c0_5 = arith.constant 0 : index
    %c0_6 = arith.constant 0 : index
    %c1 = arith.constant 1 : index
    %5 = vector.load %arg1[%c0_5, %c0_6, %c1] : memref<1x4x512xf32, #tpu.memory_space<vmem>>, vector<1x4x384xf32>
    %6 = vector.shape_cast %5 : vector<1x4x384xf32> to vector<4x384xf32>
    %c4 = arith.constant 4 : index
    %c0_7 = arith.constant 0 : index
    %7 = vector.load %arg5[%c4, %c0_7] : memref<128x384xf32, #tpu.memory_space<vmem>>, vector<4x384xf32>
    tpu.vector_store %arg5[%c4, %c0_7], %6 {strides = array<i32>} : memref<128x384xf32, #tpu.memory_space<vmem>>, vector<4x384xf32>,
    %c0_8 = arith.constant 0 : index
    %c0_9 = arith.constant 0 : index
    %c2 = arith.constant 2 : index
    %8 = vector.load %arg1[%c0_8, %c0_9, %c2] : memref<1x4x512xf32, #tpu.memory_space<vmem>>, vector<1x4x384xf32>
    %9 = vector.shape_cast %8 : vector<1x4x384xf32> to vector<4x384xf32>
    %c8 = arith.constant 8 : index
    %c0_10 = arith.constant 0 : index
    %10 = vector.load %arg5[%c8, %c0_10] : memref<128x384xf32, #tpu.memory_space<vmem>>, vector<4x384xf32>
    tpu.vector_store %arg5[%c8, %c0_10], %9 {strides = array<i32>} : memref<128x384xf32, #tpu.memory_space<vmem>>, vector<4x384xf32>,
    %c0_11 = arith.constant 0 : index
    %c0_12 = arith.constant 0 : index
    %c3 = arith.constant 3 : index
    %11 = vector.load %arg1[%c0_11, %c0_12, %c3] : memref<1x4x512xf32, #tpu.memory_space<vmem>>, vector<1x4x384xf32>
    %12 = vector.shape_cast %11 : vector<1x4x384xf32> to vector<4x384xf32>
    %c12 = arith.constant 12 : index
    %c0_13 = arith.constant 0 : index
    %13 = vector.load %arg5[%c12, %c0_13] : memref<128x384xf32, #tpu.memory_space<vmem>>, vector<4x384xf32>
    tpu.vector_store %arg5[%c12, %c0_13], %12 {strides = array<i32>} : memref<128x384xf32, #tpu.memory_space<vmem>>, vector<4x384xf32>,
    %c0_14 = arith.constant 0 : index
    %c0_15 = arith.constant 0 : index
    %c4_16 = arith.constant 4 : index
    %14 = vector.load %arg1[%c0_14, %c0_15, %c4_16] : memref<1x4x512xf32, #tpu.memory_space<vmem>>, vector<1x4x384xf32>
    %15 = vector.shape_cast %14 : vector<1x4x384xf32> to vector<4x384xf32>
    %c16 = arith.constant 16 : index
    %c0_17 = arith.constant 0 : index
    %16 = vector.load %arg5[%c16, %c0_17] : memref<128x384xf32, #tpu.memory_space<vmem>>, vector<4x384xf32>
    tpu.vector_store %arg5[%c16, %c0_17], %15 {strides = array<i32>} : memref<128x384xf32, #tpu.memory_space<vmem>>, vector<4x384xf32>,
    %c0_18 = arith.constant 0 : index
    %c0_19 = arith.constant 0 : index
    %c20 = arith.constant 20 : index
    %17 = vector.load %arg1[%c0_18, %c0_19, %c20] : memref<1x4x512xf32, #tpu.memory_space<vmem>>, vector<1x4x384xf32>
    %18 = vector.shape_cast %17 : vector<1x4x384xf32> to vector<4x384xf32>
    %c20_20 = arith.constant 20 : index
    %c0_21 = arith.constant 0 : index
    %19 = vector.load %arg5[%c20_20, %c0_21] : memref<128x384xf32, #tpu.memory_space<vmem>>, vector<4x384xf32>
    tpu.vector_store %arg5[%c20_20, %c0_21], %18 {strides = array<i32>} : memref<128x384xf32, #tpu.memory_space<vmem>>, vector<4x384xf32>,
    %c0_22 = arith.constant 0 : index
    %c0_23 = arith.constant 0 : index
    %c21 = arith.constant 21 : index
    %20 = vector.load %arg1[%c0_22, %c0_23, %c21] : memref<1x4x512xf32, #tpu.memory_space<vmem>>, vector<1x4x384xf32>
    %21 = vector.shape_cast %20 : vector<1x4x384xf32> to vector<4x384xf32>
    %c24 = arith.constant 24 : index
    %c0_24 = arith.constant 0 : index
    %22 = vector.load %arg5[%c24, %c0_24] : memref<128x384xf32, #tpu.memory_space<vmem>>, vector<4x384xf32>
    tpu.vector_store %arg5[%c24, %c0_24], %21 {strides = array<i32>} : memref<128x384xf32, #tpu.memory_space<vmem>>, vector<4x384xf32>,
    %c0_25 = arith.constant 0 : index
    %c0_26 = arith.constant 0 : index
    %c22 = arith.constant 22 : index
    %23 = vector.load %arg1[%c0_25, %c0_26, %c22] : memref<1x4x512xf32, #tpu.memory_space<vmem>>, vector<1x4x384xf32>
    %24 = vector.shape_cast %23 : vector<1x4x384xf32> to vector<4x384xf32>
    %c28 = arith.constant 28 : index
    %c0_27 = arith.constant 0 : index
    %25 = vector.load %arg5[%c28, %c0_27] : memref<128x384xf32, #tpu.memory_space<vmem>>, vector<4x384xf32>
    tpu.vector_store %arg5[%c28, %c0_27], %24 {strides = array<i32>} : memref<128x384xf32, #tpu.memory_space<vmem>>, vector<4x384xf32>,
    %c0_28 = arith.constant 0 : index
    %c0_29 = arith.constant 0 : index
    %c23 = arith.constant 23 : index
    %26 = vector.load %arg1[%c0_28, %c0_29, %c23] : memref<1x4x512xf32, #tpu.memory_space<vmem>>, vector<1x4x384xf32>
    %27 = vector.shape_cast %26 : vector<1x4x384xf32> to vector<4x384xf32>
    %c32 = arith.constant 32 : index
    %c0_30 = arith.constant 0 : index
    %28 = vector.load %arg5[%c32, %c0_30] : memref<128x384xf32, #tpu.memory_space<vmem>>, vector<4x384xf32>
    tpu.vector_store %arg5[%c32, %c0_30], %27 {strides = array<i32>} : memref<128x384xf32, #tpu.memory_space<vmem>>, vector<4x384xf32>,
    %c0_31 = arith.constant 0 : index
    %c0_32 = arith.constant 0 : index
    %c24_33 = arith.constant 24 : index
    %29 = vector.load %arg1[%c0_31, %c0_32, %c24_33] : memref<1x4x512xf32, #tpu.memory_space<vmem>>, vector<1x4x384xf32>
    %30 = vector.shape_cast %29 : vector<1x4x384xf32> to vector<4x384xf32>
    %c36 = arith.constant 36 : index
    %c0_34 = arith.constant 0 : index
    %31 = vector.load %arg5[%c36, %c0_34] : memref<128x384xf32, #tpu.memory_space<vmem>>, vector<4x384xf32>
    tpu.vector_store %arg5[%c36, %c0_34], %30 {strides = array<i32>} : memref<128x384xf32, #tpu.memory_space<vmem>>, vector<4x384xf32>,
    %c0_35 = arith.constant 0 : index
    %c0_36 = arith.constant 0 : index
    %c40 = arith.constant 40 : index
    %32 = vector.load %arg1[%c0_35, %c0_36, %c40] : memref<1x4x512xf32, #tpu.memory_space<vmem>>, vector<1x4x384xf32>
    %33 = vector.shape_cast %32 : vector<1x4x384xf32> to vector<4x384xf32>
    %c40_37 = arith.constant 40 : index
    %c0_38 = arith.constant 0 : index
    %34 = vector.load %arg5[%c40_37, %c0_38] : memref<128x384xf32, #tpu.memory_space<vmem>>, vector<4x384xf32>
    tpu.vector_store %arg5[%c40_37, %c0_38], %33 {strides = array<i32>} : memref<128x384xf32, #tpu.memory_space<vmem>>, vector<4x384xf32>,
    %c0_39 = arith.constant 0 : index
    %c0_40 = arith.constant 0 : index
    %c41 = arith.constant 41 : index
    %35 = vector.load %arg1[%c0_39, %c0_40, %c41] : memref<1x4x512xf32, #tpu.memory_space<vmem>>, vector<1x4x384xf32>
    %36 = vector.shape_cast %35 : vector<1x4x384xf32> to vector<4x384xf32>
    %c44 = arith.constant 44 : index
    %c0_41 = arith.constant 0 : index
    %37 = vector.load %arg5[%c44, %c0_41] : memref<128x384xf32, #tpu.memory_space<vmem>>, vector<4x384xf32>
    tpu.vector_store %arg5[%c44, %c0_41], %36 {strides = array<i32>} : memref<128x384xf32, #tpu.memory_space<vmem>>, vector<4x384xf32>,
    %c0_42 = arith.constant 0 : index
    %c0_43 = arith.constant 0 : index
    %c42 = arith.constant 42 : index
    %38 = vector.load %arg1[%c0_42, %c0_43, %c42] : memref<1x4x512xf32, #tpu.memory_space<vmem>>, vector<1x4x384xf32>
    %39 = vector.shape_cast %38 : vector<1x4x384xf32> to vector<4x384xf32>
    %c48 = arith.constant 48 : index
    %c0_44 = arith.constant 0 : index
    %40 = vector.load %arg5[%c48, %c0_44] : memref<128x384xf32, #tpu.memory_space<vmem>>, vector<4x384xf32>
    tpu.vector_store %arg5[%c48, %c0_44], %39 {strides = array<i32>} : memref<128x384xf32, #tpu.memory_space<vmem>>, vector<4x384xf32>,
    %c0_45 = arith.constant 0 : index
    %c0_46 = arith.constant 0 : index
    %c43 = arith.constant 43 : index
    %41 = vector.load %arg1[%c0_45, %c0_46, %c43] : memref<1x4x512xf32, #tpu.memory_space<vmem>>, vector<1x4x384xf32>
    %42 = vector.shape_cast %41 : vector<1x4x384xf32> to vector<4x384xf32>
    %c52 = arith.constant 52 : index
    %c0_47 = arith.constant 0 : index
    %43 = vector.load %arg5[%c52, %c0_47] : memref<128x384xf32, #tpu.memory_space<vmem>>, vector<4x384xf32>
    tpu.vector_store %arg5[%c52, %c0_47], %42 {strides = array<i32>} : memref<128x384xf32, #tpu.memory_space<vmem>>, vector<4x384xf32>,
    %c0_48 = arith.constant 0 : index
    %c0_49 = arith.constant 0 : index
    %c44_50 = arith.constant 44 : index
    %44 = vector.load %arg1[%c0_48, %c0_49, %c44_50] : memref<1x4x512xf32, #tpu.memory_space<vmem>>, vector<1x4x384xf32>
    %45 = vector.shape_cast %44 : vector<1x4x384xf32> to vector<4x384xf32>
    %c56 = arith.constant 56 : index
    %c0_51 = arith.constant 0 : index
    %46 = vector.load %arg5[%c56, %c0_51] : memref<128x384xf32, #tpu.memory_space<vmem>>, vector<4x384xf32>
    tpu.vector_store %arg5[%c56, %c0_51], %45 {strides = array<i32>} : memref<128x384xf32, #tpu.memory_space<vmem>>, vector<4x384xf32>,
    %c0_52 = arith.constant 0 : index
    %c0_53 = arith.constant 0 : index
    %c60 = arith.constant 60 : index
    %47 = vector.load %arg1[%c0_52, %c0_53, %c60] : memref<1x4x512xf32, #tpu.memory_space<vmem>>, vector<1x4x384xf32>
    %48 = vector.shape_cast %47 : vector<1x4x384xf32> to vector<4x384xf32>
    %c60_54 = arith.constant 60 : index
    %c0_55 = arith.constant 0 : index
    %49 = vector.load %arg5[%c60_54, %c0_55] : memref<128x384xf32, #tpu.memory_space<vmem>>, vector<4x384xf32>
    tpu.vector_store %arg5[%c60_54, %c0_55], %48 {strides = array<i32>} : memref<128x384xf32, #tpu.memory_space<vmem>>, vector<4x384xf32>,
    %c0_56 = arith.constant 0 : index
    %c0_57 = arith.constant 0 : index
    %c61 = arith.constant 61 : index
    %50 = vector.load %arg1[%c0_56, %c0_57, %c61] : memref<1x4x512xf32, #tpu.memory_space<vmem>>, vector<1x4x384xf32>
    %51 = vector.shape_cast %50 : vector<1x4x384xf32> to vector<4x384xf32>
    %c64 = arith.constant 64 : index
    %c0_58 = arith.constant 0 : index
    %52 = vector.load %arg5[%c64, %c0_58] : memref<128x384xf32, #tpu.memory_space<vmem>>, vector<4x384xf32>
    tpu.vector_store %arg5[%c64, %c0_58], %51 {strides = array<i32>} : memref<128x384xf32, #tpu.memory_space<vmem>>, vector<4x384xf32>,
    %c0_59 = arith.constant 0 : index
    %c0_60 = arith.constant 0 : index
    %c62 = arith.constant 62 : index
    %53 = vector.load %arg1[%c0_59, %c0_60, %c62] : memref<1x4x512xf32, #tpu.memory_space<vmem>>, vector<1x4x384xf32>
    %54 = vector.shape_cast %53 : vector<1x4x384xf32> to vector<4x384xf32>
    %c68 = arith.constant 68 : index
    %c0_61 = arith.constant 0 : index
    %55 = vector.load %arg5[%c68, %c0_61] : memref<128x384xf32, #tpu.memory_space<vmem>>, vector<4x384xf32>
    tpu.vector_store %arg5[%c68, %c0_61], %54 {strides = array<i32>} : memref<128x384xf32, #tpu.memory_space<vmem>>, vector<4x384xf32>,
    %c0_62 = arith.constant 0 : index
    %c0_63 = arith.constant 0 : index
    %c63 = arith.constant 63 : index
    %56 = vector.load %arg1[%c0_62, %c0_63, %c63] : memref<1x4x512xf32, #tpu.memory_space<vmem>>, vector<1x4x384xf32>
    %57 = vector.shape_cast %56 : vector<1x4x384xf32> to vector<4x384xf32>
    %c72 = arith.constant 72 : index
    %c0_64 = arith.constant 0 : index
    %58 = vector.load %arg5[%c72, %c0_64] : memref<128x384xf32, #tpu.memory_space<vmem>>, vector<4x384xf32>
    tpu.vector_store %arg5[%c72, %c0_64], %57 {strides = array<i32>} : memref<128x384xf32, #tpu.memory_space<vmem>>, vector<4x384xf32>,
    %c0_65 = arith.constant 0 : index
    %c0_66 = arith.constant 0 : index
    %c64_67 = arith.constant 64 : index
    %59 = vector.load %arg1[%c0_65, %c0_66, %c64_67] : memref<1x4x512xf32, #tpu.memory_space<vmem>>, vector<1x4x384xf32>
    %60 = vector.shape_cast %59 : vector<1x4x384xf32> to vector<4x384xf32>
    %c76 = arith.constant 76 : index
    %c0_68 = arith.constant 0 : index
    %61 = vector.load %arg5[%c76, %c0_68] : memref<128x384xf32, #tpu.memory_space<vmem>>, vector<4x384xf32>
    tpu.vector_store %arg5[%c76, %c0_68], %60 {strides = array<i32>} : memref<128x384xf32, #tpu.memory_space<vmem>>, vector<4x384xf32>,
    %c0_69 = arith.constant 0 : index
    %c0_70 = arith.constant 0 : index
    %c80 = arith.constant 80 : index
    %62 = vector.load %arg1[%c0_69, %c0_70, %c80] : memref<1x4x512xf32, #tpu.memory_space<vmem>>, vector<1x4x384xf32>
    %63 = vector.shape_cast %62 : vector<1x4x384xf32> to vector<4x384xf32>
    %c80_71 = arith.constant 80 : index
    %c0_72 = arith.constant 0 : index
    %64 = vector.load %arg5[%c80_71, %c0_72] : memref<128x384xf32, #tpu.memory_space<vmem>>, vector<4x384xf32>
    tpu.vector_store %arg5[%c80_71, %c0_72], %63 {strides = array<i32>} : memref<128x384xf32, #tpu.memory_space<vmem>>, vector<4x384xf32>,
    %c0_73 = arith.constant 0 : index
    %c0_74 = arith.constant 0 : index
    %c81 = arith.constant 81 : index
    %65 = vector.load %arg1[%c0_73, %c0_74, %c81] : memref<1x4x512xf32, #tpu.memory_space<vmem>>, vector<1x4x384xf32>
    %66 = vector.shape_cast %65 : vector<1x4x384xf32> to vector<4x384xf32>
    %c84 = arith.constant 84 : index
    %c0_75 = arith.constant 0 : index
    %67 = vector.load %arg5[%c84, %c0_75] : memref<128x384xf32, #tpu.memory_space<vmem>>, vector<4x384xf32>
    tpu.vector_store %arg5[%c84, %c0_75], %66 {strides = array<i32>} : memref<128x384xf32, #tpu.memory_space<vmem>>, vector<4x384xf32>,
    %c0_76 = arith.constant 0 : index
    %c0_77 = arith.constant 0 : index
    %c82 = arith.constant 82 : index
    %68 = vector.load %arg1[%c0_76, %c0_77, %c82] : memref<1x4x512xf32, #tpu.memory_space<vmem>>, vector<1x4x384xf32>
    %69 = vector.shape_cast %68 : vector<1x4x384xf32> to vector<4x384xf32>
    %c88 = arith.constant 88 : index
    %c0_78 = arith.constant 0 : index
    %70 = vector.load %arg5[%c88, %c0_78] : memref<128x384xf32, #tpu.memory_space<vmem>>, vector<4x384xf32>
    tpu.vector_store %arg5[%c88, %c0_78], %69 {strides = array<i32>} : memref<128x384xf32, #tpu.memory_space<vmem>>, vector<4x384xf32>,
    %c0_79 = arith.constant 0 : index
    %c0_80 = arith.constant 0 : index
    %c83 = arith.constant 83 : index
    %71 = vector.load %arg1[%c0_79, %c0_80, %c83] : memref<1x4x512xf32, #tpu.memory_space<vmem>>, vector<1x4x384xf32>
    %72 = vector.shape_cast %71 : vector<1x4x384xf32> to vector<4x384xf32>
    %c92 = arith.constant 92 : index
    %c0_81 = arith.constant 0 : index
    %73 = vector.load %arg5[%c92, %c0_81] : memref<128x384xf32, #tpu.memory_space<vmem>>, vector<4x384xf32>
    tpu.vector_store %arg5[%c92, %c0_81], %72 {strides = array<i32>} : memref<128x384xf32, #tpu.memory_space<vmem>>, vector<4x384xf32>,
    %c0_82 = arith.constant 0 : index
    %c0_83 = arith.constant 0 : index
    %c84_84 = arith.constant 84 : index
    %74 = vector.load %arg1[%c0_82, %c0_83, %c84_84] : memref<1x4x512xf32, #tpu.memory_space<vmem>>, vector<1x4x384xf32>
    %75 = vector.shape_cast %74 : vector<1x4x384xf32> to vector<4x384xf32>
    %c96 = arith.constant 96 : index
    %c0_85 = arith.constant 0 : index
    %76 = vector.load %arg5[%c96, %c0_85] : memref<128x384xf32, #tpu.memory_space<vmem>>, vector<4x384xf32>
    tpu.vector_store %arg5[%c96, %c0_85], %75 {strides = array<i32>} : memref<128x384xf32, #tpu.memory_space<vmem>>, vector<4x384xf32>,
    %c0_86 = arith.constant 0 : index
    %c0_87 = arith.constant 0 : index
    %77 = vector.load %arg2[%c0_86, %c0_87] : memref<8x128xf32, #tpu.memory_space<vmem>>, vector<8x128xf32>
    %c0_88 = arith.constant 0 : index
    %c0_89 = arith.constant 0 : index
    %78 = vector.load %arg5[%c0_88, %c0_89] : memref<128x384xf32, #tpu.memory_space<vmem>>, vector<128x384xf32>
    %cst_90 = arith.constant dense<0.000000e+00> : vector<8x384xf32>
    %79 = tpu.matmul %77, %78, %cst_90 {dimension_numbers = #tpu.dot_dimension_numbers<[1], [0], [0], [1], [0, 0, 1, 1], [], []>} : vector<8x128xf32>, vector<128x384xf32>, vector<8x384xf32> -> vector<8x384xf32>
    %c0_91 = arith.constant 0 : index
    %c0_92 = arith.constant 0 : index
    %80 = vector.load %arg3[%c0_91, %c0_92] : memref<8x1xf32, #tpu.memory_space<vmem>>, vector<8x1xf32>
    %81 = vector.broadcast %80 : vector<8x1xf32> to vector<8x384xf32>
    %82 = arith.addf %79, %81 : vector<8x384xf32>
    %c0_93 = arith.constant 0 : index
    %c0_94 = arith.constant 0 : index
    %c0_95 = arith.constant 0 : index
    %83 = vector.load %arg4[%c0_93, %c0_94, %c0_95] : memref<1x8x384xf32, #tpu.memory_space<vmem>>, vector<1x8x384xf32>
    %84 = vector.shape_cast %83 : vector<1x8x384xf32> to vector<8x384xf32>
    %85 = vector.shape_cast %82 : vector<8x384xf32> to vector<1x8x384xf32>
    tpu.vector_store %arg4[%c0_93, %c0_94, %c0_95], %85 {strides = array<i32>} : memref<1x8x384xf32, #tpu.memory_space<vmem>>, vector<1x8x384xf32>,
    return
  }
  func.func @transform_0(%arg0: i32) -> (i32, i32, i32) {
    %c0_i32 = arith.constant 0 : i32
    %c0_i32_0 = arith.constant 0 : i32
    %c0_i32_1 = arith.constant 0 : i32
    return %arg0, %c0_i32, %c0_i32_0 : i32, i32, i32
  }
  func.func @transform_1(%arg0: i32) -> (i32, i32) {
    %c0_i32 = arith.constant 0 : i32
    %c0_i32_0 = arith.constant 0 : i32
    %c0_i32_1 = arith.constant 0 : i32
    return %c0_i32, %c0_i32_0 : i32, i32
  }
  func.func @transform_2(%arg0: i32) -> (i32, i32) {
    %c0_i32 = arith.constant 0 : i32
    %c0_i32_0 = arith.constant 0 : i32
    %c0_i32_1 = arith.constant 0 : i32
    return %c0_i32, %c0_i32_0 : i32, i32
  }
  func.func @transform_3(%arg0: i32) -> (i32, i32, i32) {
    %c0_i32 = arith.constant 0 : i32
    %c0_i32_0 = arith.constant 0 : i32
    %c0_i32_1 = arith.constant 0 : i32
    return %arg0, %c0_i32, %c0_i32_0 : i32, i32, i32
  }
}

</mosaic_0001>

<bundles_post_ra>
// kernel: tpu_custom_call.1
= control target key start
LH: loop header
LB: loop body
LE: loop exit
PB: predicated region body
PF: predicated region fallthrough
CT: control target
= control target key end

     0   :  { %8 = vsyncpa [#allocation4], 0  ;;  %s1830_s0 = inlined_call_operand.hbm [shape: f32[2,4,512], index: 0, kind: input, shape index: {}]   ;;  %s1831_s1 = inlined_call_operand.vmem [shape: f32[8,128], index: 1, kind: input, shape index: {}]   ;;  %s1832_s2 = inlined_call_operand.vmem [shape: f32[8,1], index: 2, kind: input, shape index: {}]   ;;  %s1833_s3 = inlined_call_operand.hbm [shape: f32[2,8,384], index: 3, kind: output, shape index: {}]  }
   0x1   :  { %10 = vsyncpa [#allocation4 + $0x1], 0 }
   0x2   :  { %11 = vsyncpa [#allocation5], 0 }
   0x3   :  { %13 = vsyncpa [#allocation5 + $0x1], 0  ;;  %s1416_s12 = smov 0   ;;  %s1418_s13 = smov 0  }
   0x4   :  { %s1420_s14 = smov 0   ;;  %s1422_s15 = smov 0  }
   0x5 LB: > { %s1437_s16 = sadd.s32 4294967295, %s1364_s15   ;;  %s1067_s17 = sadd.s32 4294967294, %s1364_s15   ;;  %s1364_s15 = sphi %s1422_s15, %s1848_s15   ;;  %s1360_s14 = sphi %s1420_s14, %s1847_s14   ;;  %s1356_s13 = sphi %s1418_s13, %s1846_s13   ;;  %s1352_s12 = sphi %s1416_s12, %s1845_s12  }
   0x6   : > { %s1441_s18 = sadd.s32 1, %s1364_s15   ;;  %s26_s19 = sadd.s32 1, %s1360_s14 }
   0x7   : > { %s23_s20 = ssub.s32 %s1364_s15, %s1441_s18  ;;  %p33_p0 = scmp.ne.s32.totalorder %s1360_s14, %s1356_s13 }
   0x8   : > { %p24_p1 = scmp.eq.s32.totalorder %s23_s20, 0  ;;  %p34_p2 = scmp.eq.s32.totalorder %s1364_s15, 0 }
   0x9   : > { %p39_p3 = scmp.ne.s32.totalorder %s1356_s13, %s1352_s12  ;;  %p40_p4 = scmp.eq.s32.totalorder %s1437_s16, 0 }
   0xa   : > { %s1453_s21 = scalar_select %p24_p1, %s1360_s14, %s26_s19  }
   0xb   : > { %p1455_p5 = por %p34_p2, %p33_p0  ;;  %p1459_p6 = por %p40_p4, %p39_p3 }
   0xc   : > { %p105_p7 = scmp.eq.s32.totalorder %s1437_s16, 1  ;;  %p111_p8 = scmp.eq.s32.totalorder %s1067_s17, 1 }
   0xd   : > { %p1201_p10 = scmp.lt.s32.totalorder %s1364_s15, 2  ;;  %s137_s26 = sand.u32 1, %s1360_s14  }
   0xe   : > { %p1466_p11 = por %p105_p7, %p33_p0  ;;  %p1470_p12 = por %p111_p8, %p39_p3 }
   0xf   : > { %s1078_s27 = sshll.u32 %s1364_s15, 8  ;;  %s1070_s28 = sshll.u32 %s137_s26, 4 }
  0x10   : > { %s1837_s24 = scalar_select %p1466_p11, 1, 0 }
  0x11   : > { %s1838_s25 = scalar_select %p1470_p12, 1, 0 }
  0x12   : > { %s1479_s4 = scalar_lea.hbm %s1830_s0, %s1078_s27  ;;  %s141_s5 = scalar_lea.vmem [#allocation3], %s1070_s28 }
  0x13   : > { %s149_s6 = sshll.u32 %s141_s5, 4  ;;  %p1483_p13 = pnand %p1201_p10, %p1455_p5  ;;  %s1487_s6 = int_to_ptr.vmem [resolvable:$true] %s149_s6 }
  0x14   : > { %s138_s8 = scalar_lea.sflag [#allocation4], %s137_s26  ;;  %s1268_s9 = scalar_lea.hbm %s1479_s4, 256 }
  0x15   : > { %p1269_p2 = scmp.ne.s32.totalorder %s1479_s4, %s1268_s9  ;;  %p1270_p3 = pneg %p1483_p13 }
  0x16   : > { %s1273_s17 = scalar_lea.hbm %s1830_s0, 512  ;;  %p1274_p5 = scmp.lt.u32.totalorder %s1479_s4, %s1830_s0 }
  0x17   : > { %p1271_p4 = pnand %p1270_p3, %p1269_p2  ;;  %p1275_p8 = scmp.lt.u32.totalorder %s1273_s17, %s1268_s9 }
  0x18   : > { %p1277_p9 = scmp.lt.u32.totalorder %s1268_s9, %s1479_s4 }
  0x19   : > { %p1272_p7 = pneg %p1271_p4  ;;  %p1276_p10 = por %p1275_p8, %p1274_p5 }
  0x1b   : > { %p1278_p0 = por %p1277_p9, %p1276_p10 }
  0x1d   : > { %p1279_p1 = pnand %p1278_p0, %p1272_p7 }
  0x1f   : > { %1282 = shalt.err (!%p1279_p1)
}
  0x20   : > { %s1283_s22 = scalar_lea.vmem %s1487_s6, 256  ;;  %s1366_s26 = smov [#allocation3]  }
  0x21   : > { %p1284_p2 = scmp.ne.s32.totalorder %s1487_s6, %s1283_s22  ;;  %s1288_s27 = sshll.u32 %s1366_s26, 4  ;;  %s1289_s27 = int_to_ptr.vmem [resolvable:$false] %s1288_s27 }
  0x22   : > { %s1290_s28 = scalar_lea.vmem %s1289_s27, 512  ;;  %p1291_p11 = scmp.lt.s32.totalorder %s1487_s6, %s1289_s27 }
  0x23   : > { %p1286_p4 = pnand %p1284_p2, %p1270_p3  ;;  %p1292_p5 = scmp.lt.s32.totalorder %s1290_s28, %s1283_s22 }
  0x25   : > { %p1287_p12 = pneg %p1286_p4  ;;  %p1293_p8 = por %p1292_p5, %p1291_p11 }
  0x27   : > { %p1294_p9 = pnand %p1293_p8, %p1287_p12 }
  0x29   : > { %1297 = shalt.err (!%p1294_p9)
}
  0x2a   : > { %1196 = dma.hbm_to_vmem [thread:$0]  (!%p1483_p13), %s1479_s4, 256, %s1487_s6, %s138_s8  }
  0x2b   : > { %p1840_p0 = scmp.lt.s32.totalorder %s1364_s15, 3  ;;  %p1841_p1 = scmp.ge.s32.totalorder %s1364_s15, 1 }
  0x2d   : > { %p155_p3 = pnand %p1841_p1, %p1840_p0 }
  0x2e   : > { %s1521_s29 = sand.u32 (!%p155_p3), 1, %s1356_s13  }
  0x2f   : > { %158 = sbr.rel (%p155_p3) target bundleno = 606 (0x25e), region = 32  ;;  %s1074_s30 = sshll.u32 (!%p155_p3), %s1521_s29, 4 }
  0x30   : > { %s161_s5 = scalar_lea.sflag (!%p155_p3), [#allocation4], %s1521_s29  ;;  %s164_s9 = scalar_lea.vmem (!%p155_p3), [#allocation3], %s1074_s30 }
  0x36   : > { %1343 = dma.done.wait (%p1459_p6), %s161_s5, 256  }
  0x37   : > { %1345 = vsyncadd (%p1459_p6), %s161_s5, 4294967040  ;;  %v1529_v0 = vld [vmem:[%s164_s9 + $0x8] sm:$0xff]  ;;  %v1531_v1 = vld [vmem:[%s164_s9] sm:$0xff]  ;;  %s1367_s4 = smov 126   ;;  %s1368_s6 = smov 127   ;;  %v1370_v7 = vmov 0.0|0.0  }
  0x38   : > { %241 = vrot.lane.b32.xlu1 %v1529_v0, %s1367_s4  ;;  %215 = vrot.lane.b32.xlu0 %v1531_v1, %s1368_s6  ;;  %v1537_v2 = vcombine.high %v1531_v1, %v1531_v1  ;;  %204 = vst [vmem:[#allocation2] sm:$0xf] %v1531_v1  ;;  %v200_v3 = vld [vmem:[%s164_s9 + $0x8] sm:$0xf]  ;;  %s1369_s23 = smov 125   ;;  %v1545_v4 = vcombine.low %v1529_v0, %v1529_v0  ;;  %s1371_s7 = smov 124  }
  0x39   : > { %206 = vst [vmem:[#allocation2 + $0x10] sm:$0xf] %v200_v3  ;;  %v1549_v5 = vcombine.low %v1531_v1, %v1531_v1  ;;  %v1557_v6 = vcombine.high %v1529_v0, %v1529_v0  ;;  %1163 = vmatprep.subr.bf16.mxu1 %v1370_v7  ;;  %s1372_s8 = smov 108   ;;  %s1373_s10 = smov 107   ;;  %vm245_vm0 = vcmask 1031168   ;;  %vm269_vm1 = vcmask 1022976  }
  0x3a   : > { %205 = vst [vmem:[#allocation2 + $0x8] sm:$0xf] %v1537_v2  ;;  %s1374_s11 = smov 106   ;;  %s1375_s17 = smov 105   ;;  %vm221_vm2 = vcmask 1039360   ;;  %vm293_vm3 = vcmask 1014784  }
  0x3b   : > { %s1376_s19 = smov 104   ;;  %s1377_s20 = smov 88   ;;  %vm317_vm4 = vcmask 883712   ;;  %vm341_vm5 = vcmask 875520   ;;  %vm365_vm6 = vcmask 867328   ;;  %vm389_vm7 = vcmask 859136  }
  0x3c   : > { %239 = vrot.lane.b32.xlu1 %v1537_v2, %s1367_s4  ;;  %263 = vrot.lane.b32.xlu0 %v1531_v1, %s1369_s23  ;;  %s1378_s22 = smov 87   ;;  %s1379_s26 = smov 86   ;;  %vm413_vm8 = vcmask 850944   ;;  %vm437_vm9 = vcmask 719872   ;;  %vm461_vm10 = vcmask 711680   ;;  %vm1393_vm11 = vmmov 0  }
  0x3d   : > { %s1380_s27 = smov 85   ;;  %s1381_s28 = smov 84   ;;  %vm485_vm12 = vcmask 703488   ;;  %vm509_vm13 = vcmask 695296   ;;  %vm533_vm14 = vcmask 687104   ;;  %vm557_vm15 = vcmask 556032  }
  0x3e   : > { %s1382_s30 = smov 68   ;;  %s1383_s5 = smov 67  }
  0x3f   : > { %s1384_s9 = smov 66   ;;  %p1842_p11 = scmp.ne.s32.totalorder %s1837_s24, 0 }
  0x40   : > { %265 = vrot.lane.b32.xlu1 %v1545_v4, %s1369_s23  ;;  %217 = vrot.lane.b32.xlu0 %v1545_v4, %s1368_s6 }
  0x44   : > { %237 = vrot.lane.b32.xlu1 %v1531_v1, %s1367_s4  ;;  %213 = vrot.lane.b32.xlu0 %v1549_v5, %s1368_s6 }
  0x48   : > { %219 = vrot.lane.b32.xlu1 %v1529_v0, %s1368_s6  ;;  %261 = vrot.lane.b32.xlu0 %v1549_v5, %s1369_s23  ;;  %s1386_s6 = smov 64  }
  0x4c   : > { %267 = vrot.lane.b32.xlu1 %v1529_v0, %s1369_s23  ;;  %243 = vrot.lane.b32.xlu0 %v1557_v6, %s1367_s4  ;;  %s1385_s4 = smov 65   ;;  %s1387_s23 = smov 48  }
  0x50   : > { %289 = vrot.lane.b32.xlu1 %v1529_v0, %s1371_s7  ;;  %287 = vrot.lane.b32.xlu0 %v1537_v2, %s1371_s7 }
  0x54   : > { %313 = vrot.lane.b32.xlu1 %v1545_v4, %s1372_s8  ;;  %311 = vrot.lane.b32.xlu0 %v1531_v1, %s1372_s8 }
  0x58   : > { %337 = vrot.lane.b32.xlu1 %v1529_v0, %s1373_s10  ;;  %335 = vrot.lane.b32.xlu0 %v1537_v2, %s1373_s10 }
  0x5c   : > { %361 = vrot.lane.b32.xlu1 %v1545_v4, %s1374_s11  ;;  %359 = vrot.lane.b32.xlu0 %v1531_v1, %s1374_s11 }
  0x60   : > { %309 = vrot.lane.b32.xlu1 %v1549_v5, %s1372_s8  ;;  %285 = vrot.lane.b32.xlu0 %v1531_v1, %s1371_s7 }
  0x64   : > { %357 = vrot.lane.b32.xlu1 %v1549_v5, %s1374_s11  ;;  %333 = vrot.lane.b32.xlu0 %v1531_v1, %s1373_s10 }
  0x68   : > { %315 = vrot.lane.b32.xlu1 %v1529_v0, %s1372_s8  ;;  %291 = vrot.lane.b32.xlu0 %v1557_v6, %s1371_s7  ;;  %s1388_s7 = smov 47   ;;  %s1389_s8 = smov 46  }
  0x6c   : > { %363 = vrot.lane.b32.xlu1 %v1529_v0, %s1374_s11  ;;  %339 = vrot.lane.b32.xlu0 %v1557_v6, %s1373_s10  ;;  %s1390_s10 = smov 45   ;;  %s1392_s11 = smov 44  }
  0x70   : > { %385 = vrot.lane.b32.xlu1 %v1529_v0, %s1375_s17  ;;  %383 = vrot.lane.b32.xlu0 %v1537_v2, %s1375_s17 }
  0x74   : > { %409 = vrot.lane.b32.xlu1 %v1545_v4, %s1376_s19  ;;  %407 = vrot.lane.b32.xlu0 %v1531_v1, %s1376_s19 }
  0x78   : > { %433 = vrot.lane.b32.xlu1 %v1529_v0, %s1377_s20  ;;  %431 = vrot.lane.b32.xlu0 %v1537_v2, %s1377_s20 }
  0x7c   : > { %457 = vrot.lane.b32.xlu1 %v1545_v4, %s1378_s22  ;;  %455 = vrot.lane.b32.xlu0 %v1531_v1, %s1378_s22 }
  0x80   : > { %405 = vrot.lane.b32.xlu1 %v1549_v5, %s1376_s19  ;;  %381 = vrot.lane.b32.xlu0 %v1531_v1, %s1375_s17 }
  0x84   : > { %453 = vrot.lane.b32.xlu1 %v1549_v5, %s1378_s22  ;;  %429 = vrot.lane.b32.xlu0 %v1531_v1, %s1377_s20 }
  0x88   : > { %411 = vrot.lane.b32.xlu1 %v1529_v0, %s1376_s19  ;;  %387 = vrot.lane.b32.xlu0 %v1557_v6, %s1375_s17 }
  0x8c   : > { %459 = vrot.lane.b32.xlu1 %v1529_v0, %s1378_s22  ;;  %435 = vrot.lane.b32.xlu0 %v1557_v6, %s1377_s20 }
  0x90   : > { %481 = vrot.lane.b32.xlu1 %v1529_v0, %s1379_s26  ;;  %479 = vrot.lane.b32.xlu0 %v1537_v2, %s1379_s26 }
  0x94   : > { %505 = vrot.lane.b32.xlu1 %v1545_v4, %s1380_s27  ;;  %503 = vrot.lane.b32.xlu0 %v1531_v1, %s1380_s27 }
  0x98   : > { %529 = vrot.lane.b32.xlu1 %v1529_v0, %s1381_s28  ;;  %527 = vrot.lane.b32.xlu0 %v1537_v2, %s1381_s28 }
  0x9c   : > { %553 = vrot.lane.b32.xlu1 %v1545_v4, %s1382_s30  ;;  %551 = vrot.lane.b32.xlu0 %v1531_v1, %s1382_s30 }
  0xa0   : > { %501 = vrot.lane.b32.xlu1 %v1549_v5, %s1380_s27  ;;  %477 = vrot.lane.b32.xlu0 %v1531_v1, %s1379_s26 }
  0xa4   : > { %549 = vrot.lane.b32.xlu1 %v1549_v5, %s1382_s30  ;;  %525 = vrot.lane.b32.xlu0 %v1531_v1, %s1381_s28 }
  0xa8   : > { %507 = vrot.lane.b32.xlu1 %v1529_v0, %s1380_s27  ;;  %483 = vrot.lane.b32.xlu0 %v1557_v6, %s1379_s26  ;;  %s1187_s26 = smul.u32 24, %s1521_s29 }
  0xa9   : > { %s1188_s27 = smul.u32 384, %s1437_s16  ;;  %s983_s16 = scalar_lea.sflag [#allocation5], %s1521_s29 }
  0xaa   : > { %v242_v8 = vpop.permute.xlu1 %241  ;;  %v216_v9 = vpop.permute.xlu0 %215 }
  0xac   : > { %555 = vrot.lane.b32.xlu1 %v1529_v0, %s1382_s30  ;;  %531 = vrot.lane.b32.xlu0 %v1557_v6, %s1381_s28  ;;  %s186_s28 = scalar_lea.vmem [#allocation6], %s1187_s26 }
  0xad   : > { %s997_s30 = sshll.u32 %s186_s28, 4  ;;  %s1788_s30 = int_to_ptr.vmem [resolvable:$true] %s997_s30 }
  0xae   : > { %v240_v10 = vpop.permute.xlu1 %239  ;;  %v264_v11 = vpop.permute.xlu0 %263 }
  0xaf   : > { %v247_v12 = vsel %vm245_vm0, %v240_v10, %v242_v8 }
  0xb0   : > { %253 = vst [vmem:[#allocation2 + $0x20] sm:$0xf] %v247_v12  ;;  %577 = vrot.lane.b32.xlu1 %v1529_v0, %s1383_s5  ;;  %575 = vrot.lane.b32.xlu0 %v1537_v2, %s1383_s5 }
  0xb2   : > { %v266_v13 = vpop.permute.xlu1 %265  ;;  %v218_v14 = vpop.permute.xlu0 %217 }
  0xb3   : > { %v271_v15 = vsel %vm269_vm1, %v264_v11, %v266_v13  ;;  %v223_v16 = vsel %vm221_vm2, %v216_v9, %v218_v14 }
  0xb4   : > { %277 = vst [vmem:[#allocation2 + $0x20] sm:$0xf0] %v271_v15  ;;  %229 = vst [vmem:[#allocation2 + $0x8] sm:$0xf0] %v223_v16  ;;  %601 = vrot.lane.b32.xlu1 %v1545_v4, %s1384_s9  ;;  %599 = vrot.lane.b32.xlu0 %v1531_v1, %s1384_s9 }
  0xb6   : > { %v238_v17 = vpop.permute.xlu1 %237  ;;  %v214_v18 = vpop.permute.xlu0 %213 }
  0xb7   : > { %v246_v19 = vsel %vm245_vm0, %v238_v17, %v240_v10  ;;  %v222_v20 = vsel %vm221_vm2, %v214_v18, %v216_v9  ;;  %v1391_v17 = vmov 0.0  }
  0xb8   : > { %252 = vst [vmem:[#allocation2 + $0x18] sm:$0xf] %v246_v19  ;;  %228 = vst [vmem:[#allocation2] sm:$0xf0] %v222_v20  ;;  %625 = vrot.lane.b32.xlu1 %v1529_v0, %s1385_s4  ;;  %623 = vrot.lane.b32.xlu0 %v1537_v2, %s1385_s4 }
  0xb9   : > { %188 = vst [vmem:[#allocation2 + $0x128] sm:$0xf0] %v1391_v17  ;;  %187 = vst [vmem:[#allocation2 + $0x120] sm:$0xf0] %v1391_v17  ;;  %902 = vmatprep.mubr.f32.mxu0 %v1391_v17  ;;  %1128 = vmatprep.mubr.msk.f32.mxu1 %vm1393_vm11, %v1391_v17 }
  0xba   : > { %v220_v21 = vpop.permute.xlu1 %219  ;;  %v262_v22 = vpop.permute.xlu0 %261  ;;  %189 = vst [vmem:[#allocation2 + $0x130] sm:$0xf0] %v1391_v17 }
  0xbb   : > { %v224_v23 = vsel %vm221_vm2, %v218_v14, %v220_v21  ;;  %v270_v24 = vsel %vm269_vm1, %v262_v22, %v264_v11  ;;  %v785_v25 = vld [vmem:[#allocation2 + $0x8] sm:$0xff]  ;;  %v788_v26 = vld [vmem:[#allocation2 + $0x20] sm:$0xff]  ;;  %vm629_vm2 = vcmask 531456  }
  0xbc   : > { %230 = vst [vmem:[#allocation2 + $0x10] sm:$0xf0] %v224_v23  ;;  %276 = vst [vmem:[#allocation2 + $0x18] sm:$0xf0] %v270_v24  ;;  %649 = vrot.lane.b32.xlu1 %v1545_v4, %s1386_s6  ;;  %647 = vrot.lane.b32.xlu0 %v1531_v1, %s1386_s6  ;;  %v1131_v27 = vpack.c.bf16 %v788_v26, %v785_v25 }
  0xbe   : > { %v268_v28 = vpop.permute.xlu1 %267  ;;  %v244_v29 = vpop.permute.xlu0 %243  ;;  %1132 = vmatprep.subr.bf16.mxu0 %v1131_v27 }
  0xbf   : > { %v272_v30 = vsel %vm269_vm1, %v266_v13, %v268_v28  ;;  %v248_v31 = vsel %vm245_vm0, %v242_v8, %v244_v29  ;;  %v784_v35 = vld [vmem:[#allocation2] sm:$0xff]  ;;  %vm581_vm0 = vcmask 547840   ;;  %vm605_vm1 = vcmask 539648  }
  0xc0   : > { %278 = vst [vmem:[#allocation2 + $0x28] sm:$0xf0] %v272_v30  ;;  %254 = vst [vmem:[#allocation2 + $0x28] sm:$0xf] %v248_v31  ;;  %597 = vrot.lane.b32.xlu1 %v1549_v5, %s1384_s9  ;;  %573 = vrot.lane.b32.xlu0 %v1531_v1, %s1383_s5 }
  0xc2   : > { %v1641_v32 = vpop.permute.xlu1 %289  ;;  %v288_v33 = vpop.permute.xlu0 %287 }
  0xc3   : > { %v295_v34 = vsel %vm293_vm3, %v288_v33, %v1641_v32  ;;  %v787_v36 = vld [vmem:[#allocation2 + $0x18] sm:$0xff]  ;;  %v786_v41 = vld [vmem:[#allocation2 + $0x10] sm:$0xff] }
  0xc4   : > { %301 = vst [vmem:[#allocation2 + $0x38] sm:$0xf] %v295_v34  ;;  %645 = vrot.lane.b32.xlu1 %v1549_v5, %s1386_s6  ;;  %621 = vrot.lane.b32.xlu0 %v1531_v1, %s1385_s4  ;;  %v1133_v37 = vpack.c.bf16 %v787_v36, %v784_v35 }
  0xc6   : > { %v314_v38 = vpop.permute.xlu1 %313  ;;  %v312_v39 = vpop.permute.xlu0 %311  ;;  %1134 = vmatpush1.bf16.msra.mxu0 %v1133_v37 }
  0xc7   : > { %v319_v40 = vsel %vm317_vm4, %v312_v39, %v314_v38  ;;  %v789_v42 = vld [vmem:[#allocation2 + $0x28] sm:$0xff] }
  0xc8   : > { %325 = vst [vmem:[#allocation2 + $0x38] sm:$0xf0] %v319_v40  ;;  %603 = vrot.lane.b32.xlu1 %v1529_v0, %s1384_s9  ;;  %579 = vrot.lane.b32.xlu0 %v1557_v6, %s1383_s5  ;;  %v1164_v43 = vpack.c.bf16 %v789_v42, %v786_v41 }
  0xca   : > { %v338_v44 = vpop.permute.xlu1 %337  ;;  %v336_v45 = vpop.permute.xlu0 %335  ;;  %1165 = vmatpush3.bf16.msra.mxu1 %v1164_v43 }
  0xcb   : > { %v343_v46 = vsel %vm341_vm5, %v336_v45, %v338_v44  ;;  %1166 = vmatprep.subr.bf16.mxu1 %v1370_v7 }
  0xcc   : > { %349 = vst [vmem:[#allocation2 + $0x50] sm:$0xf] %v343_v46  ;;  %651 = vrot.lane.b32.xlu1 %v1529_v0, %s1386_s6  ;;  %627 = vrot.lane.b32.xlu0 %v1557_v6, %s1385_s4  ;;  %s1786_s4 = scalar_lea.hbm %s1833_s3, %s1188_s27  ;;  %s1298_s6 = scalar_lea.vmem %s1788_s30, 384 }
  0xcd   : > { %p1299_p6 = scmp.ne.s32.totalorder %s1788_s30, %s1298_s6 }
  0xce   : > { %v362_v47 = vpop.permute.xlu1 %361  ;;  %v360_v48 = vpop.permute.xlu0 %359 }
  0xcf   : > { %v367_v49 = vsel %vm365_vm6, %v360_v48, %v362_v47  ;;  %v791_v58 = vld [vmem:[#allocation2 + $0x38] sm:$0xff]  ;;  %p1300_p12 = pnand %p1299_p6, %p1842_p11 }
  0xd0   : > { %373 = vst [vmem:[#allocation2 + $0x50] sm:$0xf0] %v367_v49  ;;  %673 = vrot.lane.b32.xlu1 %v1529_v0, %s1387_s23  ;;  %671 = vrot.lane.b32.xlu0 %v1537_v2, %s1387_s23 }
  0xd1   : > { %p1301_p13 = pneg %p1300_p12 }
  0xd2   : > { %v310_v50 = vpop.permute.xlu1 %309  ;;  %v286_v51 = vpop.permute.xlu0 %285 }
  0xd3   : > { %v318_v52 = vsel %vm317_vm4, %v310_v50, %v312_v39  ;;  %v294_v53 = vsel %vm293_vm3, %v286_v51, %v288_v33  ;;  %v1394_v39 = vmov 0  }
  0xd4   : > { %324 = vst [vmem:[#allocation2 + $0x30] sm:$0xf0] %v318_v52  ;;  %300 = vst [vmem:[#allocation2 + $0x30] sm:$0xf] %v294_v53  ;;  %697 = vrot.lane.b32.xlu1 %v1545_v4, %s1388_s7  ;;  %695 = vrot.lane.b32.xlu0 %v1531_v1, %s1388_s7 }
  0xd5   : > { %1263 = vset.pattern.permute.xlu0 %v1394_v39 }
  0xd6   : > { %v358_v54 = vpop.permute.xlu1 %357  ;;  %v334_v55 = vpop.permute.xlu0 %333 }
  0xd7   : > { %v366_v56 = vsel %vm365_vm6, %v358_v54, %v360_v48  ;;  %v342_v57 = vsel %vm341_vm5, %v334_v55, %v336_v45  ;;  %v794_v59 = vld [vmem:[#allocation2 + $0x50] sm:$0xff] }
  0xd8   : > { %372 = vst [vmem:[#allocation2 + $0x48] sm:$0xf0] %v366_v56  ;;  %348 = vst [vmem:[#allocation2 + $0x48] sm:$0xf] %v342_v57  ;;  %721 = vrot.lane.b32.xlu1 %v1529_v0, %s1389_s8  ;;  %719 = vrot.lane.b32.xlu0 %v1537_v2, %s1389_s8  ;;  %v1135_v60 = vpack.c.bf16 %v794_v59, %v791_v58 }
  0xda   : > { %v316_v61 = vpop.permute.xlu1 %315  ;;  %v292_v62 = vpop.permute.xlu0 %291  ;;  %1136 = vmatprep.subr.bf16.mxu0 %v1135_v60 }
  0xdb   : > { %v320_v63 = vsel %vm317_vm4, %v314_v38, %v316_v61  ;;  %v296_v3 = vsel %vm293_vm3, %v1641_v32, %v292_v62  ;;  %v790_v12 = vld [vmem:[#allocation2 + $0x30] sm:$0xff]  ;;  %vm653_vm3 = vcmask 523264   ;;  %vm677_vm4 = vcmask 392192  }
  0xdc   : > { %326 = vst [vmem:[#allocation2 + $0x40] sm:$0xf0] %v320_v63  ;;  %302 = vst [vmem:[#allocation2 + $0x40] sm:$0xf] %v296_v3  ;;  %745 = vrot.lane.b32.xlu1 %v1545_v4, %s1390_s10  ;;  %743 = vrot.lane.b32.xlu0 %v1531_v1, %s1390_s10 }
  0xde   : > { %v364_v8 = vpop.permute.xlu1 %363  ;;  %v340_v9 = vpop.permute.xlu0 %339 }
  0xdf   : > { %v368_v10 = vsel %vm365_vm6, %v362_v47, %v364_v8  ;;  %v344_v11 = vsel %vm341_vm5, %v338_v44, %v340_v9  ;;  %v793_v13 = vld [vmem:[#allocation2 + $0x48] sm:$0xff]  ;;  %vm701_vm5 = vcmask 384000   ;;  %vm725_vm6 = vcmask 375808  }
  0xe0   : > { %374 = vst [vmem:[#allocation2 + $0x58] sm:$0xf0] %v368_v10  ;;  %350 = vst [vmem:[#allocation2 + $0x58] sm:$0xf] %v344_v11  ;;  %693 = vrot.lane.b32.xlu1 %v1549_v5, %s1388_s7  ;;  %669 = vrot.lane.b32.xlu0 %v1531_v1, %s1387_s23  ;;  %v1137_v4 = vpack.c.bf16 %v793_v13, %v790_v12 }
  0xe2   : > { %v1690_v14 = vpop.permute.xlu1 %385  ;;  %v384_v15 = vpop.permute.xlu0 %383  ;;  %1138 = vmatpush1.bf16.msra.mxu0 %v1137_v4 }
  0xe3   : > { %v391_v16 = vsel %vm389_vm7, %v384_v15, %v1690_v14  ;;  %v792_v21 = vld [vmem:[#allocation2 + $0x40] sm:$0xff] }
  0xe4   : > { %397 = vst [vmem:[#allocation2 + $0x68] sm:$0xf] %v391_v16  ;;  %741 = vrot.lane.b32.xlu1 %v1549_v5, %s1390_s10  ;;  %717 = vrot.lane.b32.xlu0 %v1531_v1, %s1389_s8 }
  0xe6   : > { %v410_v18 = vpop.permute.xlu1 %409  ;;  %v408_v19 = vpop.permute.xlu0 %407 }
  0xe7   : > { %v415_v20 = vsel %vm413_vm8, %v408_v19, %v410_v18  ;;  %v795_v22 = vld [vmem:[#allocation2 + $0x58] sm:$0xff] }
  0xe8   : > { %421 = vst [vmem:[#allocation2 + $0x68] sm:$0xf0] %v415_v20  ;;  %699 = vrot.lane.b32.xlu1 %v1529_v0, %s1388_s7  ;;  %675 = vrot.lane.b32.xlu0 %v1557_v6, %s1387_s23  ;;  %v1167_v5 = vpack.c.bf16 %v795_v22, %v792_v21  ;;  %s1395_s23 = smov [#allocation6]  }
  0xe9   : > { %s1302_s7 = sshll.u32 %s1395_s23, 4  ;;  %s1303_s7 = int_to_ptr.vmem [resolvable:$false] %s1302_s7 }
  0xea   : > { %v434_v23 = vpop.permute.xlu1 %433  ;;  %v432_v24 = vpop.permute.xlu0 %431  ;;  %1168 = vmatpush3.bf16.msra.mxu1 %v1167_v5  ;;  %p1305_p7 = scmp.lt.s32.totalorder %s1788_s30, %s1303_s7 }
  0xeb   : > { %v439_v25 = vsel %vm437_vm9, %v432_v24, %v434_v23  ;;  %1169 = vmatprep.subr.bf16.mxu1 %v1370_v7 }
  0xec   : > { %445 = vst [vmem:[#allocation2 + $0x80] sm:$0xf] %v439_v25  ;;  %747 = vrot.lane.b32.xlu1 %v1529_v0, %s1390_s10  ;;  %723 = vrot.lane.b32.xlu0 %v1557_v6, %s1389_s8  ;;  %s1304_s8 = scalar_lea.vmem %s1303_s7, 768 }
  0xed   : > { %p1306_p10 = scmp.lt.s32.totalorder %s1304_s8, %s1298_s6 }
  0xee   : > { %v458_v26 = vpop.permute.xlu1 %457  ;;  %v456_v27 = vpop.permute.xlu0 %455 }
  0xef   : > { %v463_v28 = vsel %vm461_vm10, %v456_v27, %v458_v26  ;;  %v797_v36 = vld [vmem:[#allocation2 + $0x68] sm:$0xff]  ;;  %p1307_p2 = por %p1306_p10, %p1305_p7 }
  0xf0   : > { %469 = vst [vmem:[#allocation2 + $0x80] sm:$0xf0] %v463_v28  ;;  %769 = vrot.lane.b32.xlu1 %v1529_v0, %s1392_s11  ;;  %767 = vrot.lane.b32.xlu0 %v1537_v2, %s1392_s11 }
  0xf1   : > { %p1308_p4 = pnand %p1307_p2, %p1301_p13 }
  0xf2   : > { %v406_v29 = vpop.permute.xlu1 %405  ;;  %v382_v30 = vpop.permute.xlu0 %381 }
  0xf3   : > { %v414_v31 = vsel %vm413_vm8, %v406_v29, %v408_v19  ;;  %v390_v32 = vsel %vm389_vm7, %v382_v30, %v384_v15 }
  0xf4   : > { %420 = vst [vmem:[#allocation2 + $0x60] sm:$0xf0] %v414_v31  ;;  %396 = vst [vmem:[#allocation2 + $0x60] sm:$0xf] %v390_v32  ;;  %771 = vrot.lane.b32.xlu1 %v1557_v6, %s1392_s11  ;;  %765 = vrot.lane.b32.xlu0 %v1531_v1, %s1392_s11  ;;  %v832_v6 = vld [vmem:[%s1832_s2] sm:$0xff] }
  0xf6   : > { %v454_v33 = vpop.permute.xlu1 %453  ;;  %v430_v34 = vpop.permute.xlu0 %429 }
  0xf7   : > { %v462_v35 = vsel %vm461_vm10, %v454_v33, %v456_v27  ;;  %v438_v0 = vsel %vm437_vm9, %v430_v34, %v432_v24  ;;  %v800_v2 = vld [vmem:[#allocation2 + $0x80] sm:$0xff] }
  0xf8   : > { %468 = vst [vmem:[#allocation2 + $0x78] sm:$0xf0] %v462_v35  ;;  %444 = vst [vmem:[#allocation2 + $0x78] sm:$0xf] %v438_v0  ;;  %v1139_v37 = vpack.c.bf16 %v800_v2, %v797_v36  ;;  %835 = vperm.xlu0 %1263, %v832_v6  }
  0xfa   : > { %v412_v38 = vpop.permute.xlu1 %411  ;;  %v388_v1 = vpop.permute.xlu0 %387  ;;  %1140 = vmatprep.subr.bf16.mxu0 %v1139_v37 }
  0xfb   : > { %v416_v40 = vsel %vm413_vm8, %v410_v18, %v412_v38  ;;  %v392_v41 = vsel %vm389_vm7, %v1690_v14, %v388_v1  ;;  %v796_v46 = vld [vmem:[#allocation2 + $0x60] sm:$0xff]  ;;  %vm749_vm7 = vcmask 367616   ;;  %vm773_vm8 = vcmask 359424  }
  0xfc   : > { %422 = vst [vmem:[#allocation2 + $0x70] sm:$0xf0] %v416_v40  ;;  %398 = vst [vmem:[#allocation2 + $0x70] sm:$0xf] %v392_v41 }
  0xfe   : > { %v460_v42 = vpop.permute.xlu1 %459  ;;  %v436_v43 = vpop.permute.xlu0 %435 }
  0xff   : > { %v464_v44 = vsel %vm461_vm10, %v458_v26, %v460_v42  ;;  %v440_v45 = vsel %vm437_vm9, %v434_v23, %v436_v43  ;;  %v799_v47 = vld [vmem:[#allocation2 + $0x78] sm:$0xff] }
 0x100   : > { %470 = vst [vmem:[#allocation2 + $0x88] sm:$0xf0] %v464_v44  ;;  %446 = vst [vmem:[#allocation2 + $0x88] sm:$0xf] %v440_v45  ;;  %v1141_v48 = vpack.c.bf16 %v799_v47, %v796_v46 }
 0x102   : > { %v482_v49 = vpop.permute.xlu1 %481  ;;  %v480_v50 = vpop.permute.xlu0 %479  ;;  %1142 = vmatpush1.bf16.msra.mxu0 %v1141_v48 }
 0x103   : > { %v487_v51 = vsel %vm485_vm12, %v480_v50, %v482_v49  ;;  %v798_v55 = vld [vmem:[#allocation2 + $0x70] sm:$0xff] }
 0x104   : > { %493 = vst [vmem:[#allocation2 + $0x98] sm:$0xf] %v487_v51 }
 0x106   : > { %v506_v52 = vpop.permute.xlu1 %505  ;;  %v504_v53 = vpop.permute.xlu0 %503 }
 0x107   : > { %v511_v54 = vsel %vm509_vm13, %v504_v53, %v506_v52  ;;  %v801_v56 = vld [vmem:[#allocation2 + $0x88] sm:$0xff] }
 0x108   : > { %517 = vst [vmem:[#allocation2 + $0x98] sm:$0xf0] %v511_v54  ;;  %v1170_v57 = vpack.c.bf16 %v801_v56, %v798_v55 }
 0x10a   : > { %v530_v58 = vpop.permute.xlu1 %529  ;;  %v528_v59 = vpop.permute.xlu0 %527  ;;  %1171 = vmatpush3.bf16.msra.mxu1 %v1170_v57 }
 0x10b   : > { %v535_v60 = vsel %vm533_vm14, %v528_v59, %v530_v58  ;;  %1172 = vmatprep.subr.bf16.mxu1 %v1370_v7 }
 0x10c   : > { %541 = vst [vmem:[#allocation2 + $0xb0] sm:$0xf] %v535_v60 }
 0x10e   : > { %v554_v61 = vpop.permute.xlu1 %553  ;;  %v552_v62 = vpop.permute.xlu0 %551 }
 0x10f   : > { %v559_v63 = vsel %vm557_vm15, %v552_v62, %v554_v61  ;;  %v803_v14 = vld [vmem:[#allocation2 + $0x98] sm:$0xff] }
 0x110   : > { %565 = vst [vmem:[#allocation2 + $0xb0] sm:$0xf0] %v559_v63 }
 0x112   : > { %v502_v3 = vpop.permute.xlu1 %501  ;;  %v478_v8 = vpop.permute.xlu0 %477 }
 0x113   : > { %v510_v9 = vsel %vm509_vm13, %v502_v3, %v504_v53  ;;  %v486_v10 = vsel %vm485_vm12, %v478_v8, %v480_v50 }
 0x114   : > { %516 = vst [vmem:[#allocation2 + $0x90] sm:$0xf0] %v510_v9  ;;  %492 = vst [vmem:[#allocation2 + $0x90] sm:$0xf] %v486_v10 }
 0x116   : > { %v550_v11 = vpop.permute.xlu1 %549  ;;  %v526_v12 = vpop.permute.xlu0 %525 }
 0x117   : > { %v558_v13 = vsel %vm557_vm15, %v550_v11, %v552_v62  ;;  %v534_v4 = vsel %vm533_vm14, %v526_v12, %v528_v59  ;;  %v806_v15 = vld [vmem:[#allocation2 + $0xb0] sm:$0xff] }
 0x118   : > { %564 = vst [vmem:[#allocation2 + $0xa8] sm:$0xf0] %v558_v13  ;;  %540 = vst [vmem:[#allocation2 + $0xa8] sm:$0xf] %v534_v4  ;;  %v1143_v16 = vpack.c.bf16 %v806_v15, %v803_v14 }
 0x11a   : > { %v508_v18 = vpop.permute.xlu1 %507  ;;  %v484_v19 = vpop.permute.xlu0 %483  ;;  %1144 = vmatprep.subr.bf16.mxu0 %v1143_v16 }
 0x11b   : > { %v512_v20 = vsel %vm509_vm13, %v506_v52, %v508_v18  ;;  %v488_v21 = vsel %vm485_vm12, %v482_v49, %v484_v19  ;;  %v802_v25 = vld [vmem:[#allocation2 + $0x90] sm:$0xff] }
 0x11c   : > { %518 = vst [vmem:[#allocation2 + $0xa0] sm:$0xf0] %v512_v20  ;;  %494 = vst [vmem:[#allocation2 + $0xa0] sm:$0xf] %v488_v21 }
 0x11e   : > { %v556_v22 = vpop.permute.xlu1 %555  ;;  %v532_v5 = vpop.permute.xlu0 %531 }
 0x11f   : > { %v560_v23 = vsel %vm557_vm15, %v554_v61, %v556_v22  ;;  %v536_v24 = vsel %vm533_vm14, %v530_v58, %v532_v5  ;;  %v805_v26 = vld [vmem:[#allocation2 + $0xa8] sm:$0xff] }
 0x120   : > { %566 = vst [vmem:[#allocation2 + $0xb8] sm:$0xf0] %v560_v23  ;;  %542 = vst [vmem:[#allocation2 + $0xb8] sm:$0xf] %v536_v24  ;;  %v1145_v27 = vpack.c.bf16 %v805_v26, %v802_v25 }
 0x122   : > { %v578_v28 = vpop.permute.xlu1 %577  ;;  %v576_v29 = vpop.permute.xlu0 %575  ;;  %1146 = vmatpush1.bf16.msra.mxu0 %v1145_v27 }
 0x123   : > { %v583_v30 = vsel %vm581_vm0, %v576_v29, %v578_v28  ;;  %v804_v34 = vld [vmem:[#allocation2 + $0xa0] sm:$0xff] }
 0x124   : > { %589 = vst [vmem:[#allocation2 + $0xc8] sm:$0xf] %v583_v30 }
 0x126   : > { %v602_v31 = vpop.permute.xlu1 %601  ;;  %v600_v32 = vpop.permute.xlu0 %599 }
 0x127   : > { %v607_v33 = vsel %vm605_vm1, %v600_v32, %v602_v31  ;;  %v807_v35 = vld [vmem:[#allocation2 + $0xb8] sm:$0xff] }
 0x128   : > { %613 = vst [vmem:[#allocation2 + $0xc8] sm:$0xf0] %v607_v33  ;;  %v1173_v0 = vpack.c.bf16 %v807_v35, %v804_v34 }
 0x12a   : > { %v626_v36 = vpop.permute.xlu1 %625  ;;  %v624_v2 = vpop.permute.xlu0 %623  ;;  %1174 = vmatpush3.bf16.msra.mxu1 %v1173_v0 }
 0x12b   : > { %v631_v37 = vsel %vm629_vm2, %v624_v2, %v626_v36  ;;  %1175 = vmatprep.subr.bf16.mxu1 %v1370_v7 }
 0x12c   : > { %637 = vst [vmem:[#allocation2 + $0xe0] sm:$0xf] %v631_v37 }
 0x12e   : > { %v650_v6 = vpop.permute.xlu1 %649  ;;  %v648_v38 = vpop.permute.xlu0 %647 }
 0x12f   : > { %v655_v1 = vsel %vm653_vm3, %v648_v38, %v650_v6  ;;  %v809_v47 = vld [vmem:[#allocation2 + $0xc8] sm:$0xff] }
 0x130   : > { %661 = vst [vmem:[#allocation2 + $0xe0] sm:$0xf0] %v655_v1 }
 0x132   : > { %v598_v39 = vpop.permute.xlu1 %597  ;;  %v574_v40 = vpop.permute.xlu0 %573 }
 0x133   : > { %v606_v41 = vsel %vm605_vm1, %v598_v39, %v600_v32  ;;  %v582_v42 = vsel %vm581_vm0, %v574_v40, %v576_v29 }
 0x134   : > { %612 = vst [vmem:[#allocation2 + $0xc0] sm:$0xf0] %v606_v41  ;;  %588 = vst [vmem:[#allocation2 + $0xc0] sm:$0xf] %v582_v42 }
 0x136   : > { %v646_v43 = vpop.permute.xlu1 %645  ;;  %v622_v44 = vpop.permute.xlu0 %621 }
 0x137   : > { %v654_v45 = vsel %vm653_vm3, %v646_v43, %v648_v38  ;;  %v630_v46 = vsel %vm629_vm2, %v622_v44, %v624_v2  ;;  %v812_v48 = vld [vmem:[#allocation2 + $0xe0] sm:$0xff] }
 0x138   : > { %660 = vst [vmem:[#allocation2 + $0xd8] sm:$0xf0] %v654_v45  ;;  %636 = vst [vmem:[#allocation2 + $0xd8] sm:$0xf] %v630_v46  ;;  %v1147_v49 = vpack.c.bf16 %v812_v48, %v809_v47 }
 0x13a   : > { %v604_v50 = vpop.permute.xlu1 %603  ;;  %v580_v51 = vpop.permute.xlu0 %579  ;;  %1148 = vmatprep.subr.bf16.mxu0 %v1147_v49 }
 0x13b   : > { %v608_v52 = vsel %vm605_vm1, %v602_v31, %v604_v50  ;;  %v584_v53 = vsel %vm581_vm0, %v578_v28, %v580_v51  ;;  %v808_v58 = vld [vmem:[#allocation2 + $0xc0] sm:$0xff] }
 0x13c   : > { %614 = vst [vmem:[#allocation2 + $0xd0] sm:$0xf0] %v608_v52  ;;  %590 = vst [vmem:[#allocation2 + $0xd0] sm:$0xf] %v584_v53  ;;  %v783_v52 = vld [vmem:[%s1831_s1] sm:$0xff] }
 0x13e   : > { %v652_v54 = vpop.permute.xlu1 %651  ;;  %v628_v55 = vpop.permute.xlu0 %627 }
 0x13f   : > { %v656_v56 = vsel %vm653_vm3, %v650_v6, %v652_v54  ;;  %v632_v57 = vsel %vm629_vm2, %v626_v36, %v628_v55  ;;  %v811_v59 = vld [vmem:[#allocation2 + $0xd8] sm:$0xff] }
 0x140   : > { %662 = vst [vmem:[#allocation2 + $0xe8] sm:$0xf0] %v656_v56  ;;  %638 = vst [vmem:[#allocation2 + $0xe8] sm:$0xf] %v632_v57  ;;  %v1149_v60 = vpack.c.bf16 %v811_v59, %v808_v58 }
 0x142   : > { %v674_v61 = vpop.permute.xlu1 %673  ;;  %v672_v62 = vpop.permute.xlu0 %671  ;;  %1150 = vmatpush1.bf16.msra.mxu0 %v1149_v60 }
 0x143   : > { %v679_v63 = vsel %vm677_vm4, %v672_v62, %v674_v61  ;;  %v810_v10 = vld [vmem:[#allocation2 + $0xd0] sm:$0xff] }
 0x144   : > { %685 = vst [vmem:[#allocation2 + $0xf8] sm:$0xf] %v679_v63 }
 0x146   : > { %v698_v3 = vpop.permute.xlu1 %697  ;;  %v696_v8 = vpop.permute.xlu0 %695 }
 0x147   : > { %v703_v9 = vsel %vm701_vm5, %v696_v8, %v698_v3  ;;  %v813_v11 = vld [vmem:[#allocation2 + $0xe8] sm:$0xff] }
 0x148   : > { %709 = vst [vmem:[#allocation2 + $0xf8] sm:$0xf0] %v703_v9  ;;  %v1176_v12 = vpack.c.bf16 %v813_v11, %v810_v10 }
 0x14a   : > { %v722_v13 = vpop.permute.xlu1 %721  ;;  %v720_v4 = vpop.permute.xlu0 %719  ;;  %1177 = vmatpush3.bf16.msra.mxu1 %v1176_v12 }
 0x14b   : > { %v727_v14 = vsel %vm725_vm6, %v720_v4, %v722_v13  ;;  %1178 = vmatprep.subr.bf16.mxu1 %v1370_v7 }
 0x14c   : > { %733 = vst [vmem:[#allocation2 + $0x110] sm:$0xf] %v727_v14 }
 0x14e   : > { %v746_v15 = vpop.permute.xlu1 %745  ;;  %v744_v16 = vpop.permute.xlu0 %743 }
 0x14f   : > { %v751_v18 = vsel %vm749_vm7, %v744_v16, %v746_v15  ;;  %v815_v26 = vld [vmem:[#allocation2 + $0xf8] sm:$0xff] }
 0x150   : > { %757 = vst [vmem:[#allocation2 + $0x110] sm:$0xf0] %v751_v18 }
 0x152   : > { %v694_v19 = vpop.permute.xlu1 %693  ;;  %v670_v20 = vpop.permute.xlu0 %669 }
 0x153   : > { %v702_v21 = vsel %vm701_vm5, %v694_v19, %v696_v8  ;;  %v678_v22 = vsel %vm677_vm4, %v670_v20, %v672_v62 }
 0x154   : > { %708 = vst [vmem:[#allocation2 + $0xf0] sm:$0xf0] %v702_v21  ;;  %684 = vst [vmem:[#allocation2 + $0xf0] sm:$0xf] %v678_v22 }
 0x156   : > { %v742_v5 = vpop.permute.xlu1 %741  ;;  %v718_v23 = vpop.permute.xlu0 %717 }
 0x157   : > { %v750_v24 = vsel %vm749_vm7, %v742_v5, %v744_v16  ;;  %v726_v25 = vsel %vm725_vm6, %v718_v23, %v720_v4  ;;  %v818_v27 = vld [vmem:[#allocation2 + $0x110] sm:$0xff] }
 0x158   : > { %756 = vst [vmem:[#allocation2 + $0x108] sm:$0xf0] %v750_v24  ;;  %732 = vst [vmem:[#allocation2 + $0x108] sm:$0xf] %v726_v25  ;;  %v1151_v28 = vpack.c.bf16 %v818_v27, %v815_v26 }
 0x15a   : > { %v700_v29 = vpop.permute.xlu1 %699  ;;  %v676_v30 = vpop.permute.xlu0 %675  ;;  %1152 = vmatprep.subr.bf16.mxu0 %v1151_v28 }
 0x15b   : > { %v704_v31 = vsel %vm701_vm5, %v698_v3, %v700_v29  ;;  %v680_v32 = vsel %vm677_vm4, %v674_v61, %v676_v30  ;;  %v814_v36 = vld [vmem:[#allocation2 + $0xf0] sm:$0xff] }
 0x15c   : > { %710 = vst [vmem:[#allocation2 + $0x100] sm:$0xf0] %v704_v31  ;;  %686 = vst [vmem:[#allocation2 + $0x100] sm:$0xf] %v680_v32 }
 0x15e   : > { %v748_v33 = vpop.permute.xlu1 %747  ;;  %v724_v34 = vpop.permute.xlu0 %723 }
 0x15f   : > { %v752_v35 = vsel %vm749_vm7, %v746_v15, %v748_v33  ;;  %v728_v0 = vsel %vm725_vm6, %v722_v13, %v724_v34  ;;  %v817_v2 = vld [vmem:[#allocation2 + $0x108] sm:$0xff] }
 0x160   : > { %758 = vst [vmem:[#allocation2 + $0x118] sm:$0xf0] %v752_v35  ;;  %734 = vst [vmem:[#allocation2 + $0x118] sm:$0xf] %v728_v0  ;;  %v1153_v37 = vpack.c.bf16 %v817_v2, %v814_v36 }
 0x162   : > { %v770_v6 = vpop.permute.xlu1 %769  ;;  %v768_v38 = vpop.permute.xlu0 %767  ;;  %1154 = vmatpush1.bf16.msra.mxu0 %v1153_v37 }
 0x163   : > { %v775_v1 = vsel %vm773_vm8, %v768_v38, %v770_v6  ;;  %v816_v43 = vld [vmem:[#allocation2 + $0x100] sm:$0xff] }
 0x164   : > { %781 = vst [vmem:[#allocation2 + $0x128] sm:$0xf] %v775_v1 }
 0x166   : > { %v772_v39 = vpop.permute.xlu1 %771  ;;  %v766_v40 = vpop.permute.xlu0 %765 }
 0x167   : > { %v776_v41 = vsel %vm773_vm8, %v770_v6, %v772_v39  ;;  %v774_v42 = vsel %vm773_vm8, %v766_v40, %v768_v38  ;;  %v819_v44 = vld [vmem:[#allocation2 + $0x118] sm:$0xff] }
 0x168   : > { %782 = vst [vmem:[#allocation2 + $0x130] sm:$0xf] %v776_v41  ;;  %780 = vst [vmem:[#allocation2 + $0x120] sm:$0xf] %v774_v42  ;;  %v1179_v45 = vpack.c.bf16 %v819_v44, %v816_v43 }
 0x16a   : > { %1180 = vmatpush3.bf16.msra.mxu1 %v1179_v45 }
 0x16b   : > { %v821_v46 = vld [vmem:[#allocation2 + $0x128] sm:$0xff]  ;;  %1181 = vmatprep.subr.bf16.mxu1 %v1370_v7 }
 0x16c   : > { %v1155_v47 = vpack.c.bf16 %v1391_v17, %v821_v46 }
 0x16e   : > { %1156 = vmatprep.subr.bf16.mxu0 %v1155_v47 }
 0x16f   : > { %v820_v48 = vld [vmem:[#allocation2 + $0x120] sm:$0xff]  ;;  %v822_v49 = vld [vmem:[#allocation2 + $0x130] sm:$0xff] }
 0x170   : > { %v1157_v50 = vpack.c.bf16 %v1391_v17, %v820_v48  ;;  %v1182_v51 = vpack.c.bf16 %v1391_v17, %v822_v49 }
 0x172   : > { %1158 = vmatpush1.bf16.msra.mxu0 %v1157_v50  ;;  %1183 = vmatpush3.bf16.msra.mxu1 %v1182_v51 }
 0x173   : > { %1160 = vmatprep.subr.bf16.mxu0 %v1370_v7  ;;  %1184 = vmatprep.subr.bf16.mxu1 %v1370_v7 }
 0x176   : > { %1162 = vmatpush1.bf16.msra.mxu0 %v1370_v7  ;;  %1186 = vmatpush3.bf16.msra.mxu1 %v1370_v7 }
 0x177   : > { %v836_v53 = vpop.permute.xlu0 %835 }
 0x179   : > { %903 = vmatmul.mubr.f32.vlgmr.msra.gmra.mrb[0].mxu0 %v783_v52  ;;  %1129 = vmatmul.mubr.f32.vlgmr.msra.gmra.mrb[0].mxu1 %v783_v52 }
 0x24c   : > { %v904_v17 = vpop.f32.mrb[0].mxu0  ;;  %v975_v54 = vpop.f32.mrb[0].mxu1 }
 0x24d   : > { %v905_v55 = vadd.f32 %v904_v17, %v836_v53  ;;  %v976_v56 = vadd.f32 %v975_v54, %v836_v53  ;;  %v906_v57 = vpop.f32.mrb[1].mxu0  ;;  %v1130_v58 = vpop.f32.mrb[1].mxu1 }
 0x24e   : > { %v907_v7 = vadd.f32 %v906_v57, %v836_v53 }
 0x24f   : > { %979 = vst [vmem:[%s186_s28] sm:$0xff] %v905_v55  ;;  %981 = vst [vmem:[%s186_s28 + $0x10] sm:$0xff] %v976_v56 }
 0x250   : > { %980 = vst [vmem:[%s186_s28 + $0x8] sm:$0xff] %v907_v7 }
 0x251   : > { %1311 = shalt.err (!%p1308_p4)
}
 0x252   : > { %s1312_s29 = scalar_lea.hbm %s1786_s4, 384  ;;  %s1316_s17 = scalar_lea.hbm %s1833_s3, 768 }
 0x253   : > { %p1313_p5 = scmp.ne.s32.totalorder %s1786_s4, %s1312_s29  ;;  %p1317_p0 = scmp.lt.u32.totalorder %s1786_s4, %s1833_s3 }
 0x254   : > { %p1318_p1 = scmp.lt.u32.totalorder %s1316_s17, %s1312_s29  ;;  %p1320_p6 = scmp.lt.u32.totalorder %s1312_s29, %s1786_s4 }
 0x255   : > { %p1314_p8 = pnand %p1313_p5, %p1842_p11 }
 0x256   : > { %p1319_p3 = por %p1318_p1, %p1317_p0 }
 0x257   : > { %p1315_p9 = pneg %p1314_p8 }
 0x258   : > { %p1321_p12 = por %p1320_p6, %p1319_p3 }
 0x25a   : > { %p1322_p13 = pnand %p1321_p12, %p1315_p9 }
 0x25c   : > { %1325 = shalt.err (!%p1322_p13)
}
 0x25d   : > { %1191 = dma.vmem_to_hbm [thread:$0]  (%p1842_p11), %s1788_s30, 384, %s1786_s4, %s983_s16  }
 0x25e PF: > { %s1009_s22 = sand.u32 1, %s1352_s12   ;;  %p1843_p7 = scmp.ne.s32.totalorder %s1838_s25, 0 }
 0x25f   : > { %p1844_p10 = scmp.ge.s32.totalorder %s1364_s15, 2  ;;  %s1010_s26 = scalar_lea.sflag [#allocation5], %s1009_s22 }
 0x261   : > { %p1198_p2 = pnand %p1844_p10, %p1843_p7 }
 0x263   : > { %1347 = dma.done.wait (!%p1198_p2), %s1010_s26, 384  }
 0x264   : > { %1349 = vsyncadd (!%p1198_p2), %s1010_s26, 4294966912  ;;  %p16_p4 = scmp.ge.s32.totalorder %s1441_s18, 4   ;;  %s1845_s12 = smov %s1356_s13 }
 0x265   : > { %s1846_s13 = smov %s1360_s14  ;;  %s1847_s14 = smov %s1453_s21 }
 0x266   : > { %s1848_s15 = smov %s1441_s18  ;;  %18 = sbr.rel (!%p16_p4) target bundleno = 5 (0x5), region = 77 }
 0x26d   :  { %1015 = vsyncpa [#allocation4], 1 }
 0x26e   :  { %1017 = vsyncpa [#allocation4 + $0x1], 1 }
 0x26f   :  { %1018 = vsyncpa [#allocation5], 1 }
 0x270   :  { %1020 = vsyncpa [#allocation5 + $0x1], 1 }

</bundles_post_ra>
